<compile_context>
chip_gen: v5e
topology: v5e:2x2
jax: 0.10.0
libtpu: 0.0.40
codegen_flags: <defaults>
</compile_context>

<pallas_src>
import functools

import numpy as np
import jax
import jax.numpy as jnp
from jax.experimental import pallas as pl
from jax.experimental.pallas import tpu as pltpu


_VMEM_LIMIT = 48 * 1024 * 1024       # stay under ~48 MiB (v7x VMEM is 64 MiB)
_WIN_BUDGET = 4 * 1024 * 1024        # per-step x-window VMEM budget (bytes)
_ACC_BUDGET = 512 * 1024             # per-step f32 accumulator budget (bytes)
_MAX_BLOCKDIAG_GROUPS = 16           # G<=16 -> block-diag MXU, else VPU FMA


def _round_up(x, m):
    return ((x + m - 1) // m) * m


def _cdiv(a, b):
    return -(-a // b)


# ----------------------------------------------------------------------------
# Pallas kernels
# ----------------------------------------------------------------------------
def _mm_kernel(x_ref, w_ref, b_ref, o_ref, *, Kt, Lt, lrelu):
    """Dense / block-diagonal conv as per-tap MXU matmuls.

    x_ref: (1, Lt+Kt-1, Cin_e)   w_ref: (Kt, Cin_e, Ct)
    b_ref: (1, Ct)               o_ref: (1, Lt, Ct)
    """
    ct = o_ref.shape[-1]
    acc = jnp.zeros((Lt, ct), jnp.float32)
    for k in range(Kt):                          # static unroll (Kt <= 41)
        acc = acc + jnp.dot(x_ref[0, k:k + Lt, :], w_ref[k],
                            preferred_element_type=jnp.float32)
    acc = acc + b_ref[...]
    if lrelu:
        acc = jnp.where(acc >= 0, acc, 0.2 * acc)
    o_ref[0] = acc.astype(o_ref.dtype)


def _gfma_kernel(x_ref, w_ref, b_ref, o_ref, *, Kp, R, Lt, lrelu):
    """Grouped conv as VPU broadcast-FMAs over lane-dense (Lt, Ct) tiles.

    x_ref: (1, R, Lt+Kp-1, Ct)   w_ref: (Kp, R, 1, Ct)
    b_ref: (1, Ct)               o_ref: (1, Lt, Ct)
    """
    ct = o_ref.shape[-1]
    acc = jnp.zeros((Lt, ct), jnp.float32)
    for r in range(R):                           # static unroll (R*Kp <= 176)
        for k in range(Kp):
            acc = acc + x_ref[0, r, k:k + Lt, :] * w_ref[k, r]
    acc = acc + b_ref[...]
    if lrelu:
        acc = jnp.where(acc >= 0, acc, 0.2 * acc)
    o_ref[0] = acc.astype(o_ref.dtype)


# ----------------------------------------------------------------------------
# pallas_call wrappers (layout glue only)
# ----------------------------------------------------------------------------
def _choose_time_tile(lout, win_row_bytes, halo, acc_row_bytes):
    lt = _round_up(max(lout, 8), 8)
    cap_win = max(8, ((_WIN_BUDGET // max(win_row_bytes, 1)) - halo) // 8 * 8)
    cap_acc = max(8, (_ACC_BUDGET // max(acc_row_bytes, 1)) // 8 * 8)
    lt = min(lt, cap_win, cap_acc)
    return lt, _cdiv(lout, lt)


def _window_time(x, n_t, lt, lw):
    """(B, L, ...) -> (B*n_t, lw, ...) overlapping time windows (halo = lw-lt)."""
    b = x.shape[0]
    need = (n_t - 1) * lt + lw
    if x.shape[1] < need:
        pads = [(0, 0)] * x.ndim
        pads[1] = (0, need - x.shape[1])
        x = jnp.pad(x, pads)
    if n_t == 1:
        return x[:, :lw]
    wins = jnp.stack([x[:, i * lt:i * lt + lw] for i in range(n_t)], axis=1)
    return wins.reshape((b * n_t, lw) + tuple(x.shape[2:]))


def _mm_call(xt, lp, lout, lrelu):
    """xt: (B, Lx, Cin_e) -> (B, lout, Cout) via the MXU tap-matmul kernel."""
    b, _, cin_e = xt.shape
    assert cin_e == lp["Cin_e"]
    cout, ct, kt = lp["Cout"], lp["ct"], lp["Kt"]
    n_co = cout // ct
    halo = kt - 1
    lt, n_t = _choose_time_tile(lout, cin_e * 4, halo, ct * 4)
    lw = lt + halo
    xw = _window_time(xt, n_t, lt, lw)               # (B*n_t, lw, Cin_e)
    bt = b * n_t
    kern = functools.partial(_mm_kernel, Kt=kt, Lt=lt, lrelu=lrelu)
    out = pl.pallas_call(
        kern,
        out_shape=jax.ShapeDtypeStruct((bt, lt, cout), jnp.float32),
        grid=(n_co, bt),                             # weights change slowest
        in_specs=[
            pl.BlockSpec((1, lw, cin_e), lambda co, i: (i, 0, 0)),
            pl.BlockSpec((kt, cin_e, ct), lambda co, i: (0, 0, co)),
            pl.BlockSpec((1, ct), lambda co, i: (0, co)),
        ],
        out_specs=pl.BlockSpec((1, lt, ct), lambda co, i: (i, 0, co)),
        compiler_params=pltpu.CompilerParams(
            dimension_semantics=("parallel", "parallel"),
            vmem_limit_bytes=_VMEM_LIMIT),
    )(xw, lp["w"], lp["b"])
    return out.reshape(b, n_t * lt, cout)[:, :lout]


def _gfma_call(xe, lp, lout, lrelu):
    """xe: (B, Lp, R, Cout) expanded/polyphase input -> (B, lout, Cout)."""
    b, _, r, cout = xe.shape
    kp, ct = lp["Kt"], lp["ct"]
    n_co = cout // ct
    halo = kp - 1
    lt, n_t = _choose_time_tile(lout, r * ct * 4, halo, ct * 4)
    lw = lt + halo
    xw = _window_time(xe, n_t, lt, lw)               # (B*n_t, lw, R, Cout)
    xw = xw.transpose(0, 2, 1, 3)                    # (B*n_t, R, lw, Cout)
    bt = b * n_t
    kern = functools.partial(_gfma_kernel, Kp=kp, R=r, Lt=lt, lrelu=lrelu)
    out = pl.pallas_call(
        kern,
        out_shape=jax.ShapeDtypeStruct((bt, lt, cout), jnp.float32),
        grid=(n_co, bt),
        in_specs=[
            pl.BlockSpec((1, r, lw, ct), lambda co, i: (i, 0, 0, co)),
            pl.BlockSpec((kp, r, 1, ct), lambda co, i: (0, 0, 0, co)),
            pl.BlockSpec((1, ct), lambda co, i: (0, co)),
        ],
        out_specs=pl.BlockSpec((1, lt, ct), lambda co, i: (i, 0, co)),
        compiler_params=pltpu.CompilerParams(
            dimension_semantics=("parallel", "parallel"),
            vmem_limit_bytes=_VMEM_LIMIT),
    )(xw, lp["w"], lp["b"])
    return out.reshape(b, n_t * lt, cout)[:, :lout]


def conv_layer(x, lp, lrelu):
    """Grouped Conv1d (+ optional fused LeakyReLU(0.2)).  x: (B, L, Cin) NLC."""
    b, l, cin = x.shape
    k, s, pd = lp["K"], lp["stride"], lp["pad"]
    lpad = l + 2 * pd
    lout = (lpad - k) // s + 1
    if lp.get("pqmf", False):
        lout = l // s                 # match reference updown-conv output length
    kind = lp["kind"]

    if kind == "im2col":              # Cin == 1: fold K (and stride) into lanes
        xp = jnp.pad(x[..., 0], ((0, 0), (pd, pd)))
        idx = np.arange(lout)[:, None] * s + np.arange(k)[None, :]
        xt = xp[:, idx]                                  # (B, lout, K)
        return _mm_call(xt, lp, lout, lrelu)

    if kind == "mm":                  # dense / block-diagonal MXU path
        xp = jnp.pad(x, ((0, 0), (pd, pd), (0, 0)))
        if s > 1:                     # polyphase: stride folded into channels
            lpad2 = _round_up(lpad, s)
            if lpad2 > lpad:
                xp = jnp.pad(xp, ((0, 0), (0, lpad2 - lpad), (0, 0)))
            xp = xp.reshape(b, lpad2 // s, s * cin)
        return _mm_call(xp, lp, lout, lrelu)

    # kind == "gfma": heavily grouped layer, VPU broadcast-FMA path
    g, cin_g, cout_g = lp["G"], lp["Cin_g"], lp["Cout_g"]
    r, cout = lp["R"], lp["Cout"]
    xp = jnp.pad(x, ((0, 0), (pd, pd), (0, 0)))
    lpad2 = _round_up(lpad, s)
    if lpad2 > lpad:
        xp = jnp.pad(xp, ((0, 0), (0, lpad2 - lpad), (0, 0)))
    lpoly = lpad2 // s
    # replicate each group's input channels onto the lanes of the output
    # channels they feed: xe[b,t,(p*cin_g+j),(grp*cout_g+u)] = x[b,t*s+p,grp*cin_g+j]
    xg = xp.reshape(b, lpoly, s, g, cin_g).transpose(0, 1, 2, 4, 3)
    xe = jnp.broadcast_to(xg[..., None], (b, lpoly, s, cin_g, g, cout_g))
    xe = xe.reshape(b, lpoly, r, cout)
    return _gfma_call(xe, lp, lout, lrelu)


# ----------------------------------------------------------------------------
# Parameters (weights are pre-packed at init time: block-diag / polyphase / etc)
# ----------------------------------------------------------------------------
COMBD_H_U = [16, 64, 256, 1024, 1024, 1024]
COMBD_D_K = [[7, 11, 11, 11, 11, 5], [11, 21, 21, 21, 21, 5],
             [15, 41, 41, 41, 41, 5]]
COMBD_D_S = [[1, 1, 4, 4, 4, 1]] * 3
COMBD_D_G = [[1, 4, 16, 64, 256, 1]] * 3          # dilation is 1 everywhere
COMBD_D_P = [[3, 5, 5, 5, 5, 2], [5, 10, 10, 10, 10, 2],
             [7, 20, 20, 20, 20, 2]]
COMBD_OP_F = [1, 1, 1]
COMBD_OP_K = [3, 3, 3]
COMBD_OP_G = [1, 1, 1]


def _init_conv(key, cout, cin_g, k):
    kw, kb = jax.random.split(key)
    fan_in = cin_g * k
    w = jax.random.normal(kw, (cout, cin_g, k), jnp.float32) / float(np.sqrt(fan_in))
    b = 0.01 * jax.random.normal(kb, (cout,), jnp.float32)
    return np.asarray(w), np.asarray(b)


def _make_layer_params(key, cin, cout, k, s, g, p):
    cin_g = cin // g
    cout_g = cout // g
    w, b = _init_conv(key, cout, cin_g, k)            # (cout, cin_g, k), (cout,)
    ct = cout if cout <= 256 else 256
    lp = dict(K=k, stride=s, pad=p, G=g, Cin=cin, Cout=cout,
              Cin_g=cin_g, Cout_g=cout_g, ct=ct,
              b=jnp.asarray(b.reshape(1, cout)))

    if cin == 1:
        # Cin==1: fold K into the contraction dim (im2col happens in the wrapper).
        lp.update(kind="im2col", Kt=1, Cin_e=k,
                  w=jnp.asarray(np.ascontiguousarray(w[:, 0, :].T)[None]))
        return lp

    if g > _MAX_BLOCKDIAG_GROUPS:
        # VPU broadcast-FMA path; weights become per-lane vectors per
        # (polyphase tap, phase*cin_g + j) plane.
        kp = _cdiv(k, s)
        r = s * cin_g
        wg = np.zeros((kp, r, 1, cout), np.float32)
        for kpi in range(kp):
            for ph in range(s):
                kk = kpi * s + ph
                if kk >= k:
                    continue
                for j in range(cin_g):
                    wg[kpi, ph * cin_g + j, 0, :] = w[:, j, kk]
        lp.update(kind="gfma", Kt=kp, R=r, w=jnp.asarray(wg))
        return lp

    # Dense / block-diagonal MXU path (polyphase folds the stride).
    kt = _cdiv(k, s)
    cin_e = s * cin
    wd = np.zeros((kt, cin_e, cout), np.float32)
    for kti in range(kt):
        for ph in range(s):
            kk = kti * s + ph
            if kk >= k:
                continue
            base = ph * cin
            for gi in range(g):
                wd[kti, base + gi * cin_g:base + (gi + 1) * cin_g,
                   gi * cout_g:(gi + 1) * cout_g] = \
                    w[gi * cout_g:(gi + 1) * cout_g, :, kk].T
    lp.update(kind="mm", Kt=kt, Cin_e=cin_e, w=jnp.asarray(wd))
    return lp


def design_prototype_filter(taps=62, cutoff_ratio=0.142, beta=9.0):
    assert taps % 2 == 0
    assert 0.0 < cutoff_ratio < 1.0
    omega_c = np.pi * cutoff_ratio
    n = np.arange(taps + 1)
    with np.errstate(invalid="ignore", divide="ignore"):
        h_i = np.sin(omega_c * (n - 0.5 * taps)) / (np.pi * (n - 0.5 * taps))
    h_i[taps // 2] = np.cos(0) * cutoff_ratio
    return h_i * np.kaiser(taps + 1, beta)


def make_pqmf_band0_params(subbands, taps, cutoff_ratio, beta):
    # Only band 0 of PQMF.analysis() is consumed by CoMBD, and the one-hot
    # "updown" filter + stride is just a stride-`subbands` sub-sampling, so the
    # whole analysis path reduces to a single strided band-0 FIR (im2col +
    # one MXU matmul).  Results are identical to the reference path.
    h_proto = design_prototype_filter(taps, cutoff_ratio, beta)
    n = np.arange(taps + 1)
    h0 = 2.0 * h_proto * np.cos(
        (np.pi / (2.0 * subbands)) * (n - taps / 2.0) + np.pi / 4.0)
    k = taps + 1
    return dict(kind="im2col", pqmf=True, K=k, stride=subbands, pad=taps // 2,
                Cin=1, Cout=1, ct=1, Kt=1, Cin_e=k,
                w=jnp.asarray(h0.reshape(1, k, 1), jnp.float32),
                b=jnp.zeros((1, 1), jnp.float32))


def make_combd_params(key):
    blocks = []
    for bi in range(3):
        h_u = COMBD_H_U
        filters = [[1, h_u[0]]] + [[h_u[i], h_u[i + 1]] for i in range(len(h_u) - 1)]
        convs = []
        for f, k, s, g, p in zip(filters, COMBD_D_K[bi], COMBD_D_S[bi],
                                 COMBD_D_G[bi], COMBD_D_P[bi]):
            key, sub = jax.random.split(key)
            convs.append(_make_layer_params(sub, f[0], f[1], k, s, g, p))
        key, sub = jax.random.split(key)
        proj = _make_layer_params(sub, filters[-1][1], COMBD_OP_F[bi],
                                  COMBD_OP_K[bi], 1, COMBD_OP_G[bi], 0)
        blocks.append(dict(convs=convs, proj=proj))
    pqmfs = [make_pqmf_band0_params(4, 192, 0.13, 10.0),
             make_pqmf_band0_params(2, 256, 0.25, 10.0)]
    return dict(blocks=blocks, pqmfs=pqmfs)


# ----------------------------------------------------------------------------
# CoMBD forward (activations kept in NLC; NCL restored only on outputs)
# ----------------------------------------------------------------------------
def combd_block_forward(block, x, b_y, b_y_hat):
    fmap_r, fmap_g = [], []
    for lp in block["convs"]:
        x = conv_layer(x, lp, lrelu=True)
        f_r = x[:b_y].transpose(0, 2, 1)          # NCL for returned fmaps
        f_g = x[b_y:].transpose(0, 2, 1)
        fmap_r.append(jnp.tile(f_r, (2, 1, 1)) if b_y < b_y_hat else f_r)
        fmap_g.append(f_g)
    # TODO(synk): the projection output has only 1 channel (1/128 lanes); for
    # very long signals it could be packed time-onto-lanes for denser stores.
    x = conv_layer(x, block["proj"], lrelu=False)
    x_r = x[:b_y].transpose(0, 2, 1)
    x_g = x[b_y:].transpose(0, 2, 1)
    x_r = jnp.tile(x_r, (2, 1, 1)) if b_y < b_y_hat else x_r
    return x_r, x_g, fmap_r, fmap_g


def combd_forward(params, ys, ys_hat):
    ys_nlc = [y.transpose(0, 2, 1) for y in ys]
    ys_hat_nlc = [y.transpose(0, 2, 1) for y in ys_hat]
    multi_scale_inputs_hat = [conv_layer(ys_hat_nlc[-1], p, lrelu=False)
                              for p in params["pqmfs"]]
    inputs_fake = [
        jnp.concatenate([y, multi_scale_inputs_hat[i]], axis=0)
        if i != len(ys_hat_nlc) - 1 else y
        for i, y in enumerate(ys_hat_nlc)
    ]
    outs_real, outs_fake, f_maps_real, f_maps_fake = [], [], [], []
    for y, y_hat, block in zip(ys_nlc, inputs_fake, params["blocks"]):
        b_y, b_y_hat = y.shape[0], y_hat.shape[0]
        cat_y = jnp.concatenate([y, y_hat], axis=0)
        o_r, o_f, fm_r, fm_f = combd_block_forward(block, cat_y, b_y, b_y_hat)
        outs_real.append(o_r)
        outs_fake.append(o_f)
        f_maps_real.append(fm_r)
        f_maps_fake.append(fm_f)
    return outs_real, outs_fake, f_maps_real, f_maps_fake


if __name__ == "__main__":
    key = jax.random.PRNGKey(0)
    k_params, kr, kf = jax.random.split(key, 3)

    # T=640 keeps the stride-64 conv stack long enough for the k=3 projection
    # conv in every block while staying small.
    B, T = 2, 640
    lens = [T // 4, T // 2, T]

    params = make_combd_params(k_params)
    kr_list = jax.random.split(kr, 3)
    kf_list = jax.random.split(kf, 3)
    ys = [jax.random.normal(k, (B, 1, l), jnp.float32)
          for k, l in zip(kr_list, lens)]
    ys_hat = [jax.random.normal(k, (B, 1, l), jnp.float32)
              for k, l in zip(kf_list, lens)]

    out = combd_forward(params, ys, ys_hat)
    jax.block_until_ready(out)
    print("KERNEL_OK")
</pallas_src>

<mosaic_0001>
module attributes {stable_mosaic.version = 11 : i64} {
  func.func @_mm_kernel(%arg0: i32, %arg1: i32, %arg2: memref<1x160x193xf32, #tpu.memory_space<vmem>>, %arg3: memref<1x193x1xf32, #tpu.memory_space<vmem>>, %arg4: memref<1x1xf32, #tpu.memory_space<vmem>>, %arg5: memref<1x160x1xf32, #tpu.memory_space<vmem>>) attributes {dimension_semantics = [#tpu.dimension_semantics<parallel>, #tpu.dimension_semantics<parallel>], iteration_bounds = array<i64: 1, 2>, scalar_prefetch = 0 : i64, scratch_operands = 0 : i64, tpu.core_type = #tpu.core_type<tc>, window_params = [{transform_indices = @transform_0, window_bounds = array<i64: 1, 160, 193>}, {transform_indices = @transform_1, window_bounds = array<i64: 1, 193, 1>}, {transform_indices = @transform_2, window_bounds = array<i64: 1, 1>}, {transform_indices = @transform_3, window_bounds = array<i64: 1, 160, 1>}]} {
    %cst = arith.constant 0.000000e+00 : f32
    %0 = vector.broadcast %cst : f32 to vector<160x1xf32>
    %c0 = arith.constant 0 : index
    %c0_0 = arith.constant 0 : index
    %c0_1 = arith.constant 0 : index
    %1 = vector.load %arg2[%c0, %c0_0, %c0_1] : memref<1x160x193xf32, #tpu.memory_space<vmem>>, vector<1x160x193xf32>
    %2 = vector.shape_cast %1 : vector<1x160x193xf32> to vector<160x193xf32>
    %c0_2 = arith.constant 0 : index
    %c0_3 = arith.constant 0 : index
    %c0_4 = arith.constant 0 : index
    %3 = vector.load %arg3[%c0_2, %c0_3, %c0_4] : memref<1x193x1xf32, #tpu.memory_space<vmem>>, vector<1x193x1xf32>
    %4 = vector.shape_cast %3 : vector<1x193x1xf32> to vector<193x1xf32>
    %cst_5 = arith.constant dense<0.000000e+00> : vector<160x1xf32>
    %5 = tpu.matmul %2, %4, %cst_5 {dimension_numbers = #tpu.dot_dimension_numbers<[1], [0], [0], [1], [0, 0, 1, 1], [], []>} : vector<160x193xf32>, vector<193x1xf32>, vector<160x1xf32> -> vector<160x1xf32>
    %6 = arith.addf %0, %5 : vector<160x1xf32>
    %c0_6 = arith.constant 0 : index
    %c0_7 = arith.constant 0 : index
    %7 = vector.load %arg4[%c0_6, %c0_7] : memref<1x1xf32, #tpu.memory_space<vmem>>, vector<1x1xf32>
    %8 = vector.broadcast %7 : vector<1x1xf32> to vector<160x1xf32>
    %9 = arith.addf %6, %8 : vector<160x1xf32>
    %c0_8 = arith.constant 0 : index
    %c0_9 = arith.constant 0 : index
    %c0_10 = arith.constant 0 : index
    %10 = vector.load %arg5[%c0_8, %c0_9, %c0_10] : memref<1x160x1xf32, #tpu.memory_space<vmem>>, vector<1x160x1xf32>
    %11 = vector.shape_cast %10 : vector<1x160x1xf32> to vector<160x1xf32>
    %12 = vector.shape_cast %9 : vector<160x1xf32> to vector<1x160x1xf32>
    tpu.vector_store %arg5[%c0_8, %c0_9, %c0_10], %12 {strides = array<i32>} : memref<1x160x1xf32, #tpu.memory_space<vmem>>, vector<1x160x1xf32>,
    return
  }
  func.func @transform_0(%arg0: i32, %arg1: i32) -> (i32, i32, i32) {
    %c0_i32 = arith.constant 0 : i32
    %c0_i32_0 = arith.constant 0 : i32
    %c0_i32_1 = arith.constant 0 : i32
    return %arg1, %c0_i32, %c0_i32_0 : i32, i32, i32
  }
  func.func @transform_1(%arg0: i32, %arg1: i32) -> (i32, i32, i32) {
    %c0_i32 = arith.constant 0 : i32
    %c0_i32_0 = arith.constant 0 : i32
    %c0_i32_1 = arith.constant 0 : i32
    return %c0_i32, %c0_i32_0, %arg0 : i32, i32, i32
  }
  func.func @transform_2(%arg0: i32, %arg1: i32) -> (i32, i32) {
    %c0_i32 = arith.constant 0 : i32
    %c0_i32_0 = arith.constant 0 : i32
    return %c0_i32, %arg0 : i32, i32
  }
  func.func @transform_3(%arg0: i32, %arg1: i32) -> (i32, i32, i32) {
    %c0_i32 = arith.constant 0 : i32
    %c0_i32_0 = arith.constant 0 : i32
    return %arg1, %c0_i32, %arg0 : i32, i32, i32
  }
}

</mosaic_0001>

<bundles_post_ra>
// kernel: tpu_custom_call.1
= control target key start
LH: loop header
LB: loop body
LE: loop exit
PB: predicated region body
PF: predicated region fallthrough
CT: control target
= control target key end

     0   :  { %s1180_s0 = inlined_call_operand.hbm [shape: f32[2,160,193], index: 0, kind: input, shape index: {}]   ;;  %s1181_s1 = inlined_call_operand.vmem [shape: f32[1,193,1], index: 1, kind: input, shape index: {}]   ;;  %s1182_s2 = inlined_call_operand.<no memory space> [shape: f32[1,1], index: 2, kind: input, shape index: {}]   ;;  %s1183_s3 = inlined_call_operand.vmem [shape: f32[2,160,1], index: 3, kind: output, shape index: {}]  }
   0x1   :  { %v8_v0 = vstv %s1182_s2 }
   0x2   :  { %9 = vst [vmem:[#allocation2] sm:$0x1] %v8_v0 }
   0x3   :  { %10 = vsyncpa [#allocation4], 0 }
   0x4   :  { %12 = vsyncpa [#allocation4 + $0x1], 0  ;;  %s897_s14 = smov 0   ;;  %s899_s15 = smov 0  }
   0x5   :  { %s901_s16 = smov 0   ;;  %s903_s17 = smov 0  }
   0x6   :  { %s905_s18 = smov 0   ;;  %s907_s19 = smov 0  }
   0x7 LB: > { %s671_s2 = sadd.s32 4294967295, %s870_s19   ;;  %s27_s20 = sadd.s32 1, %s866_s18  ;;  %s870_s19 = sphi %s907_s19, %s18_s19   ;;  %s866_s18 = sphi %s905_s18, %s1189_s18   ;;  %s862_s17 = sphi %s903_s17, %s1188_s17   ;;  %s858_s16 = sphi %s901_s16, %s1187_s16   ;;  %s854_s15 = sphi %s899_s15, %s1186_s15   ;;  %s850_s14 = sphi %s897_s14, %s1185_s14  }
   0x8   : > { %p28_p0 = scmp.ge.s32.totalorder %s27_s20, 2  ;;  %s37_s21 = sadd.s32 1, %s858_s16 }
   0x9   : > { %p44_p1 = scmp.ne.s32.totalorder %s858_s16, %s854_s15  ;;  %p45_p2 = scmp.eq.s32.totalorder %s870_s19, 0 }
   0xa   : > { %s1191_s20 = smov (%p28_p0, %s27_s20), 0  ;;  %p50_p4 = scmp.ne.s32.totalorder %s854_s15, %s850_s14 }
   0xb   : > { %p46_p3 = por %p45_p2, %p44_p1  ;;  %s34_s22 = ssub.s32 %s866_s18, %s1191_s20 }
   0xc   : > { %p51_p5 = scmp.eq.s32.totalorder %s671_s2, 0  ;;  %p35_p6 = scmp.eq.s32.totalorder %s34_s22, 0 }
   0xd   : > { %p738_p8 = scmp.lt.s32.totalorder %s870_s19, 2  ;;  %s167_s25 = sand.u32 1, %s858_s16  }
   0xe   : > { %p936_p7 = por %p51_p5, %p50_p4  ;;  %s729_s26 = smul.u32 320, %s866_s18 }
   0xf   : > { %s942_s24 = scalar_select %p35_p6, %s858_s16, %s37_s21  }
  0x10   : > { %s728_s27 = smul.u32 320, %s167_s25  ;;  %s176_s30 = scalar_lea.hbm %s1180_s0, %s729_s26 }
  0x11   : > { %p735_p9 = pnand %p738_p8, %p46_p3  ;;  %s177_s4 = sshll.u32 %s176_s30, 4  ;;  %s178_s4 = int_to_ptr.hbm [resolvable:$true] %s177_s4 }
  0x12   : > { %s171_s5 = scalar_lea.vmem [#allocation3], %s728_s27  ;;  %s168_s7 = scalar_lea.sflag [#allocation4], %s167_s25 }
  0x13   : > { %s179_s6 = sshll.u32 %s171_s5, 4  ;;  %s872_s8 = smov 256   ;;  %s180_s6 = int_to_ptr.vmem [resolvable:$true] %s179_s6 }
  0x14   : > { %s873_s9 = smov 16   ;;  %p678_p10 = scmp.ge.s32.totalorder %s870_s19, 1 }
  0x15   : > { %737 = dma.hbm_to_vmem [thread:$0]  (!%p735_p9), %s178_s4, 5120, %s180_s6, %s168_s7, %s872_s8, %s872_s8, %s873_s9  }
  0x16   : > { %p187_p11 = scmp.lt.s32.totalorder %s870_s19, 3 }
  0x18   : > { %p188_p12 = pnand %p678_p10, %p187_p11 }
  0x19   : > { %s193_s10 = sand.u32 (!%p188_p12), 1, %s854_s15  }
  0x1a   : > { %191 = sbr.rel (%p188_p12) target bundleno = 281 (0x119), region = 32  ;;  %s194_s12 = scalar_lea.sflag (!%p188_p12), [#allocation4], %s193_s10 }
  0x1b   : > { %s730_s11 = smul.u32 (!%p188_p12), 320, %s193_s10 }
  0x1d   : > { %s952_s13 = scalar_lea.vmem (!%p188_p12), [#allocation3], %s730_s11 }
  0x1f   : > { %845 = dma.done.wait (%p936_p7), %s194_s12, 5120  }
  0x20   : > { %847 = vsyncadd (%p936_p7), %s194_s12, 4294962176  ;;  %vm376_vm0 = vcmask 1040384   ;;  %v301_v1 = vld [vmem:[%s1181_s1 + $0x78] sm:$0xff]  ;;  %v310_v2 = vld [vmem:[%s1181_s1 + $0xc0] sm:$0x1]  ;;  %vm315_vm1 = vcmask 531456  }
  0x21   : > { %v300_v3 = vld [vmem:[%s1181_s1 + $0x70] sm:$0xff]  ;;  %703 = vmatpush.msra.mxu2 %v301_v1  ;;  %680 = vmatpush.msk.msra.mxu1 %vm376_vm0, %v310_v2  ;;  %v309_v4 = vld [vmem:[%s1181_s1 + $0xb8] sm:$0xff]  ;;  %v299_v5 = vld [vmem:[%s1181_s1 + $0x68] sm:$0xff]  ;;  %p238_p13 = scmp.lt.s32.totalorder %s862_s17, 1  ;;  %vm534_vm2 = vcmask 7168  }
  0x22   : > { %v308_v6 = vld [vmem:[%s1181_s1 + $0xb0] sm:$0xff]  ;;  %380 = vmatpush.msra.mxu0 %v301_v1  ;;  %719 = vmatpush.msk.msra.mxu3 %vm376_vm0, %v310_v2  ;;  %v298_v7 = vld [vmem:[%s1181_s1 + $0x60] sm:$0xff]  ;;  %v307_v8 = vld [vmem:[%s1181_s1 + $0xa8] sm:$0xff] }
  0x23   : > { %704 = vmatpush.msra.mxu2 %v300_v3  ;;  %465 = vmatpush.msra.mxu1 %v309_v4  ;;  %v297_v9 = vld [vmem:[%s1181_s1 + $0x58] sm:$0xff]  ;;  %v306_v10 = vld [vmem:[%s1181_s1 + $0xa0] sm:$0xff]  ;;  %v296_v11 = vld [vmem:[%s1181_s1 + $0x50] sm:$0xff]  ;;  %s1193_s17 = smov (!%p238_p13, %s862_s17), 1 }
  0x24   : > { %381 = vmatpush.msra.mxu0 %v300_v3  ;;  %720 = vmatpush.msra.mxu3 %v309_v4  ;;  %v305_v12 = vld [vmem:[%s1181_s1 + $0x98] sm:$0xff]  ;;  %v295_v13 = vld [vmem:[%s1181_s1 + $0x48] sm:$0xff]  ;;  %v304_v14 = vld [vmem:[%s1181_s1 + $0x90] sm:$0xff]  ;;  %s731_s30 = smul.u32 160, %s1193_s17 }
  0x25   : > { %705 = vmatpush.msra.mxu2 %v299_v5  ;;  %466 = vmatpush.msra.mxu1 %v308_v6  ;;  %v294_v15 = vld [vmem:[%s1181_s1 + $0x40] sm:$0xff]  ;;  %v303_v16 = vld [vmem:[%s1181_s1 + $0x88] sm:$0xff]  ;;  %v293_v17 = vld [vmem:[%s1181_s1 + $0x38] sm:$0xff] }
  0x26   : > { %382 = vmatpush.msra.mxu0 %v299_v5  ;;  %721 = vmatpush.msra.mxu3 %v308_v6  ;;  %v302_v18 = vld [vmem:[%s1181_s1 + $0x80] sm:$0xff]  ;;  %v247_v19 = vld [vmem:[%s952_s13 + $0x8] sm:$0xff]  ;;  %v289_v24 = vld [vmem:[%s1181_s1 + $0x18] sm:$0xff]  ;;  %s1101_s6 = scalar_lea.vmem %s1183_s3, %s731_s30 }
  0x27   : > { %706 = vmatpush.msra.mxu2 %v298_v7  ;;  %467 = vmatpush.msra.mxu1 %v307_v8  ;;  %v292_v20 = vld [vmem:[%s1181_s1 + $0x30] sm:$0xff]  ;;  %v269_v21 = vld [vmem:[%s952_s13 + $0xb8] sm:$0xff]  ;;  %v291_v22 = vld [vmem:[%s1181_s1 + $0x28] sm:$0xff] }
  0x28   : > { %383 = vmatpush.msra.mxu0 %v298_v7  ;;  %722 = vmatpush.msra.mxu3 %v307_v8  ;;  %v290_v23 = vld [vmem:[%s1181_s1 + $0x20] sm:$0xff]  ;;  %v288_v26 = vld [vmem:[%s1181_s1 + $0x10] sm:$0xff]  ;;  %v287_v28 = vld [vmem:[%s1181_s1 + $0x8] sm:$0xff] }
  0x29   : > { %707 = vmatpush.msra.mxu2 %v297_v9  ;;  %468 = vmatpush.msra.mxu1 %v306_v10  ;;  %v249_v25 = vld [vmem:[%s952_s13 + $0x18] sm:$0xff]  ;;  %v271_v27 = vld [vmem:[%s952_s13 + $0xc8] sm:$0xff]  ;;  %v264_v30 = vld [vmem:[%s952_s13 + $0x90] sm:$0xff] }
  0x2a   : > { %384 = vmatpush.msra.mxu0 %v297_v9  ;;  %723 = vmatpush.msra.mxu3 %v306_v10  ;;  %v286_v29 = vld [vmem:[%s1181_s1] sm:$0xff]  ;;  %v251_v32 = vld [vmem:[%s952_s13 + $0x28] sm:$0xff]  ;;  %v248_v35 = vld [vmem:[%s952_s13 + $0x10] sm:$0xff] }
  0x2b   : > { %708 = vmatpush.msra.mxu2 %v296_v11  ;;  %469 = vmatpush.msra.mxu1 %v305_v12  ;;  %v246_v31 = vld [vmem:[%s952_s13] sm:$0xff]  ;;  %v273_v33 = vld [vmem:[%s952_s13 + $0xd8] sm:$0xff]  ;;  %v275_v37 = vld [vmem:[%s952_s13 + $0xe8] sm:$0xff] }
  0x2c   : > { %385 = vmatpush.msra.mxu0 %v296_v11  ;;  %724 = vmatpush.msra.mxu3 %v305_v12  ;;  %v266_v34 = vld [vmem:[%s952_s13 + $0xa0] sm:$0xff]  ;;  %v253_v36 = vld [vmem:[%s952_s13 + $0x38] sm:$0xff]  ;;  %v268_v38 = vld [vmem:[%s952_s13 + $0xb0] sm:$0xff] }
  0x2d   : > { %709 = vmatpush.msra.mxu2 %v295_v13  ;;  %470 = vmatpush.msra.mxu1 %v304_v14  ;;  %v250_v39 = vld [vmem:[%s952_s13 + $0x20] sm:$0xff]  ;;  %v255_v40 = vld [vmem:[%s952_s13 + $0x48] sm:$0xff]  ;;  %v277_v41 = vld [vmem:[%s952_s13 + $0xf8] sm:$0xff] }
  0x2e   : > { %386 = vmatpush.msra.mxu0 %v295_v13  ;;  %725 = vmatpush.msra.mxu3 %v304_v14  ;;  %v270_v42 = vld [vmem:[%s952_s13 + $0xc0] sm:$0xff]  ;;  %v252_v43 = vld [vmem:[%s952_s13 + $0x30] sm:$0xff]  ;;  %v257_v44 = vld [vmem:[%s952_s13 + $0x58] sm:$0xff] }
  0x2f   : > { %710 = vmatpush.msra.mxu2 %v294_v15  ;;  %471 = vmatpush.msra.mxu1 %v303_v16  ;;  %v279_v45 = vld [vmem:[%s952_s13 + $0x108] sm:$0xff]  ;;  %v272_v46 = vld [vmem:[%s952_s13 + $0xd0] sm:$0xff]  ;;  %v254_v47 = vld [vmem:[%s952_s13 + $0x40] sm:$0xff] }
  0x30   : > { %387 = vmatpush.msra.mxu0 %v294_v15  ;;  %726 = vmatpush.msra.mxu3 %v303_v16  ;;  %v259_v48 = vld [vmem:[%s952_s13 + $0x68] sm:$0xff]  ;;  %v281_v49 = vld [vmem:[%s952_s13 + $0x118] sm:$0xff]  ;;  %v274_v50 = vld [vmem:[%s952_s13 + $0xe0] sm:$0xff] }
  0x31   : > { %711 = vmatpush.msra.mxu2 %v293_v17  ;;  %472 = vmatpush.msra.mxu1 %v302_v18  ;;  %v256_v51 = vld [vmem:[%s952_s13 + $0x50] sm:$0xff]  ;;  %v261_v52 = vld [vmem:[%s952_s13 + $0x78] sm:$0xff]  ;;  %v283_v53 = vld [vmem:[%s952_s13 + $0x128] sm:$0xff] }
  0x32   : > { %681 = vmatmul.msk.f32.vlgmr.msra.gmra.mxu1 %vm315_vm1, %v247_v19  ;;  %388 = vmatpush.msra.mxu0 %v293_v17  ;;  %v276_v54 = vld [vmem:[%s952_s13 + $0xf0] sm:$0xff]  ;;  %v258_v55 = vld [vmem:[%s952_s13 + $0x60] sm:$0xff]  ;;  %v263_v56 = vld [vmem:[%s952_s13 + $0x88] sm:$0xff] }
  0x33   : > { %712 = vmatpush.msra.mxu2 %v292_v20  ;;  %727 = vmatpush.msra.mxu3 %v302_v18  ;;  %v285_v57 = vld [vmem:[%s952_s13 + $0x138] sm:$0xff]  ;;  %v278_v58 = vld [vmem:[%s952_s13 + $0x100] sm:$0xff]  ;;  %v260_v59 = vld [vmem:[%s952_s13 + $0x70] sm:$0xff] }
  0x34   : > { %389 = vmatpush.msra.mxu0 %v292_v20  ;;  %692 = vmatmul.msk.f32.vlgmr.msra.gmra.mxu3 %vm315_vm1, %v269_v21  ;;  %v265_v60 = vld [vmem:[%s952_s13 + $0x98] sm:$0xff]  ;;  %v280_v61 = vld [vmem:[%s952_s13 + $0x110] sm:$0xff]  ;;  %v262_v62 = vld [vmem:[%s952_s13 + $0x80] sm:$0xff] }
  0x35   : > { %713 = vmatpush.msra.mxu2 %v291_v22  ;;  %v267_v63 = vld [vmem:[%s952_s13 + $0xa8] sm:$0xff]  ;;  %v282_v0 = vld [vmem:[%s952_s13 + $0x120] sm:$0xff]  ;;  %v284_v1 = vld [vmem:[%s952_s13 + $0x130] sm:$0xff] }
  0x36   : > { %390 = vmatpush.msra.mxu0 %v291_v22  ;;  %v1095_v4 = vld [vmem:[#allocation2] ss:$0 sm:$0xff] }
  0x37   : > { %714 = vmatpush.msra.mxu2 %v290_v23 }
  0x38   : > { %391 = vmatpush.msra.mxu0 %v290_v23 }
  0x39   : > { %715 = vmatpush.msra.mxu2 %v289_v24 }
  0x3a   : > { %682 = vmatmul.msk.f32.gmra.mxu1 %vm315_vm1, %v249_v25  ;;  %392 = vmatpush.msra.mxu0 %v289_v24 }
  0x3b   : > { %716 = vmatpush.msra.mxu2 %v288_v26 }
  0x3c   : > { %393 = vmatpush.msra.mxu0 %v288_v26  ;;  %693 = vmatmul.msk.f32.gmra.mxu3 %vm315_vm1, %v271_v27 }
  0x3d   : > { %717 = vmatpush.msra.mxu2 %v287_v28 }
  0x3e   : > { %394 = vmatpush.msra.mxu0 %v287_v28 }
  0x3f   : > { %718 = vmatpush.msra.mxu2 %v286_v29 }
  0x40   : > { %423 = vmatmul.f32.vlgmr.msra.gmra.mxu2 %v264_v30  ;;  %395 = vmatpush.msra.mxu0 %v286_v29 }
  0x41   : > { %396 = vmatmul.f32.vlgmr.msra.gmra.mxu0 %v246_v31 }
  0x42   : > { %683 = vmatmul.msk.f32.gmra.mxu1 %vm315_vm1, %v251_v32 }
  0x44   : > { %694 = vmatmul.msk.f32.gmra.mxu3 %vm315_vm1, %v273_v33 }
  0x48   : > { %426 = vmatmul.f32.gmra.mxu2 %v266_v34 }
  0x49   : > { %399 = vmatmul.f32.gmra.mxu0 %v248_v35 }
  0x4a   : > { %684 = vmatmul.msk.f32.gmra.mxu1 %vm315_vm1, %v253_v36 }
  0x4c   : > { %695 = vmatmul.msk.f32.gmra.mxu3 %vm315_vm1, %v275_v37 }
  0x50   : > { %429 = vmatmul.f32.gmra.mxu2 %v268_v38 }
  0x51   : > { %402 = vmatmul.f32.gmra.mxu0 %v250_v39 }
  0x52   : > { %685 = vmatmul.msk.f32.gmra.mxu1 %vm315_vm1, %v255_v40 }
  0x54   : > { %696 = vmatmul.msk.f32.gmra.mxu3 %vm315_vm1, %v277_v41 }
  0x58   : > { %432 = vmatmul.f32.gmra.mxu2 %v270_v42 }
  0x59   : > { %405 = vmatmul.f32.gmra.mxu0 %v252_v43 }
  0x5a   : > { %686 = vmatmul.msk.f32.gmra.mxu1 %vm315_vm1, %v257_v44 }
  0x5c   : > { %697 = vmatmul.msk.f32.gmra.mxu3 %vm315_vm1, %v279_v45 }
  0x60   : > { %435 = vmatmul.f32.gmra.mxu2 %v272_v46 }
  0x61   : > { %408 = vmatmul.f32.gmra.mxu0 %v254_v47 }
  0x62   : > { %687 = vmatmul.msk.f32.gmra.mxu1 %vm315_vm1, %v259_v48 }
  0x64   : > { %698 = vmatmul.msk.f32.gmra.mxu3 %vm315_vm1, %v281_v49 }
  0x68   : > { %438 = vmatmul.f32.gmra.mxu2 %v274_v50 }
  0x69   : > { %411 = vmatmul.f32.gmra.mxu0 %v256_v51 }
  0x6a   : > { %688 = vmatmul.msk.f32.gmra.mxu1 %vm315_vm1, %v261_v52 }
  0x6c   : > { %699 = vmatmul.msk.f32.gmra.mxu3 %vm315_vm1, %v283_v53 }
  0x70   : > { %441 = vmatmul.f32.gmra.mxu2 %v276_v54 }
  0x71   : > { %414 = vmatmul.f32.gmra.mxu0 %v258_v55 }
  0x72   : > { %689 = vmatmul.msk.f32.gmra.mxu1 %vm315_vm1, %v263_v56 }
  0x74   : > { %700 = vmatmul.msk.f32.gmra.mxu3 %vm315_vm1, %v285_v57 }
  0x78   : > { %444 = vmatmul.f32.gmra.mxu2 %v278_v58 }
  0x79   : > { %417 = vmatmul.f32.gmra.mxu0 %v260_v59 }
  0x7a   : > { %690 = vmatmul.msk.f32.gmra.mxu1 %vm315_vm1, %v265_v60 }
  0x80   : > { %447 = vmatmul.f32.gmra.mxu2 %v280_v61 }
  0x81   : > { %420 = vmatmul.f32.gmra.mxu0 %v262_v62 }
  0x82   : > { %691 = vmatmul.msk.f32.gmra.mxu1 %vm315_vm1, %v267_v63 }
  0x88   : > { %450 = vmatmul.f32.gmra.mxu2 %v282_v0 }
  0x90   : > { %453 = vmatmul.f32.gmra.mxu2 %v284_v1 }
  0xaf   : > { %v474_v2 = vpop.f32.mrf.mxu1 }
  0xb7   : > { %v477_v3 = vpop.f32.mrf.mxu1  ;;  %v507_v10 = vpop.f32.mrf.mxu3 }
  0xbe   : > { %v397_v5 = vpop.f32.mrf.mxu0 }
  0xbf   : > { %v480_v6 = vpop.f32.mrf.mxu1  ;;  %v398_v7 = vadd.f32 %v1095_v4, %v397_v5  ;;  %v510_v16 = vpop.f32.mrf.mxu3 }
  0xc1   : > { %v475_v8 = vadd.f32 %v474_v2, %v398_v7 }
  0xc3   : > { %535 = vst.msk [vmem:[%s1101_s6] sm:$0xff] %vm534_vm2, %v475_v8  ;;  %v424_v9 = vpop.f32.mrf.mxu2 }
  0xc4   : > { %v425_v55 = vadd.f32 %v1095_v4, %v424_v9 }
  0xc6   : > { %v400_v11 = vpop.f32.mrf.mxu0 }
  0xc7   : > { %v483_v12 = vpop.f32.mrf.mxu1  ;;  %v401_v13 = vadd.f32 %v1095_v4, %v400_v11  ;;  %v513_v27 = vpop.f32.mrf.mxu3 }
  0xc9   : > { %v478_v14 = vadd.f32 %v477_v3, %v401_v13 }
  0xcb   : > { %536 = vst.msk [vmem:[%s1101_s6 + $0x8] sm:$0xff] %vm534_vm2, %v478_v14  ;;  %v427_v15 = vpop.f32.mrf.mxu2 }
  0xcc   : > { %v428_v0 = vadd.f32 %v1095_v4, %v427_v15 }
  0xce   : > { %v403_v17 = vpop.f32.mrf.mxu0 }
  0xcf   : > { %v486_v18 = vpop.f32.mrf.mxu1  ;;  %v404_v19 = vadd.f32 %v1095_v4, %v403_v17  ;;  %v516_v36 = vpop.f32.mrf.mxu3 }
  0xd1   : > { %v481_v20 = vadd.f32 %v480_v6, %v404_v19 }
  0xd3   : > { %537 = vst.msk [vmem:[%s1101_s6 + $0x10] sm:$0xff] %vm534_vm2, %v481_v20  ;;  %v430_v21 = vpop.f32.mrf.mxu2 }
  0xd4   : > { %v431_v22 = vadd.f32 %v1095_v4, %v430_v21 }
  0xd6   : > { %v508_v23 = vadd.f32 %v507_v10, %v431_v22  ;;  %v406_v24 = vpop.f32.mrf.mxu0 }
  0xd7   : > { %v489_v25 = vpop.f32.mrf.mxu1  ;;  %v407_v26 = vadd.f32 %v1095_v4, %v406_v24  ;;  %v519_v45 = vpop.f32.mrf.mxu3 }
  0xd8   : > { %546 = vst.msk [vmem:[%s1101_s6 + $0x58] sm:$0xff] %vm534_vm2, %v508_v23 }
  0xd9   : > { %v484_v28 = vadd.f32 %v483_v12, %v407_v26 }
  0xdb   : > { %538 = vst.msk [vmem:[%s1101_s6 + $0x18] sm:$0xff] %vm534_vm2, %v484_v28  ;;  %v433_v29 = vpop.f32.mrf.mxu2 }
  0xdc   : > { %v434_v30 = vadd.f32 %v1095_v4, %v433_v29 }
  0xde   : > { %v511_v31 = vadd.f32 %v510_v16, %v434_v30  ;;  %v409_v32 = vpop.f32.mrf.mxu0 }
  0xdf   : > { %v492_v33 = vpop.f32.mrf.mxu1  ;;  %v410_v34 = vadd.f32 %v1095_v4, %v409_v32  ;;  %v522_v54 = vpop.f32.mrf.mxu3 }
  0xe0   : > { %547 = vst.msk [vmem:[%s1101_s6 + $0x60] sm:$0xff] %vm534_vm2, %v511_v31 }
  0xe1   : > { %v487_v35 = vadd.f32 %v486_v18, %v410_v34 }
  0xe3   : > { %539 = vst.msk [vmem:[%s1101_s6 + $0x20] sm:$0xff] %vm534_vm2, %v487_v35  ;;  %v436_v37 = vpop.f32.mrf.mxu2 }
  0xe4   : > { %v437_v38 = vadd.f32 %v1095_v4, %v436_v37 }
  0xe6   : > { %v514_v39 = vadd.f32 %v513_v27, %v437_v38  ;;  %v412_v40 = vpop.f32.mrf.mxu0 }
  0xe7   : > { %v495_v41 = vpop.f32.mrf.mxu1  ;;  %v413_v42 = vadd.f32 %v1095_v4, %v412_v40  ;;  %v525_v6 = vpop.f32.mrf.mxu3 }
  0xe8   : > { %548 = vst.msk [vmem:[%s1101_s6 + $0x68] sm:$0xff] %vm534_vm2, %v514_v39 }
  0xe9   : > { %v490_v43 = vadd.f32 %v489_v25, %v413_v42 }
  0xeb   : > { %540 = vst.msk [vmem:[%s1101_s6 + $0x28] sm:$0xff] %vm534_vm2, %v490_v43  ;;  %v439_v44 = vpop.f32.mrf.mxu2 }
  0xec   : > { %v440_v46 = vadd.f32 %v1095_v4, %v439_v44 }
  0xee   : > { %v517_v47 = vadd.f32 %v516_v36, %v440_v46  ;;  %v415_v48 = vpop.f32.mrf.mxu0 }
  0xef   : > { %v498_v49 = vpop.f32.mrf.mxu1  ;;  %v416_v50 = vadd.f32 %v1095_v4, %v415_v48  ;;  %v528_v12 = vpop.f32.mrf.mxu3 }
  0xf0   : > { %549 = vst.msk [vmem:[%s1101_s6 + $0x70] sm:$0xff] %vm534_vm2, %v517_v47 }
  0xf1   : > { %v493_v51 = vadd.f32 %v492_v33, %v416_v50 }
  0xf3   : > { %541 = vst.msk [vmem:[%s1101_s6 + $0x30] sm:$0xff] %vm534_vm2, %v493_v51  ;;  %v442_v52 = vpop.f32.mrf.mxu2 }
  0xf4   : > { %v443_v53 = vadd.f32 %v1095_v4, %v442_v52 }
  0xf6   : > { %v520_v56 = vadd.f32 %v519_v45, %v443_v53  ;;  %v418_v57 = vpop.f32.mrf.mxu0 }
  0xf7   : > { %v501_v58 = vpop.f32.mrf.mxu1  ;;  %v419_v59 = vadd.f32 %v1095_v4, %v418_v57  ;;  %v531_v17 = vpop.f32.mrf.mxu3 }
  0xf8   : > { %550 = vst.msk [vmem:[%s1101_s6 + $0x78] sm:$0xff] %vm534_vm2, %v520_v56  ;;  %v502_v60 = vadd.f32 %v501_v58, %v425_v55 }
  0xf9   : > { %v496_v61 = vadd.f32 %v495_v41, %v419_v59 }
  0xfa   : > { %544 = vst.msk [vmem:[%s1101_s6 + $0x48] sm:$0xff] %vm534_vm2, %v502_v60 }
  0xfb   : > { %542 = vst.msk [vmem:[%s1101_s6 + $0x38] sm:$0xff] %vm534_vm2, %v496_v61  ;;  %v445_v62 = vpop.f32.mrf.mxu2 }
  0xfc   : > { %v446_v63 = vadd.f32 %v1095_v4, %v445_v62 }
  0xfe   : > { %v523_v1 = vadd.f32 %v522_v54, %v446_v63  ;;  %v421_v2 = vpop.f32.mrf.mxu0 }
  0xff   : > { %v504_v3 = vpop.f32.mrf.mxu1  ;;  %v422_v5 = vadd.f32 %v1095_v4, %v421_v2 }
 0x100   : > { %551 = vst.msk [vmem:[%s1101_s6 + $0x80] sm:$0xff] %vm534_vm2, %v523_v1  ;;  %v505_v7 = vadd.f32 %v504_v3, %v428_v0 }
 0x101   : > { %v499_v8 = vadd.f32 %v498_v49, %v422_v5 }
 0x102   : > { %545 = vst.msk [vmem:[%s1101_s6 + $0x50] sm:$0xff] %vm534_vm2, %v505_v7 }
 0x103   : > { %543 = vst.msk [vmem:[%s1101_s6 + $0x40] sm:$0xff] %vm534_vm2, %v499_v8  ;;  %v448_v9 = vpop.f32.mrf.mxu2 }
 0x104   : > { %v449_v10 = vadd.f32 %v1095_v4, %v448_v9 }
 0x106   : > { %v526_v11 = vadd.f32 %v525_v6, %v449_v10 }
 0x108   : > { %552 = vst.msk [vmem:[%s1101_s6 + $0x88] sm:$0xff] %vm534_vm2, %v526_v11 }
 0x10b   : > { %v451_v13 = vpop.f32.mrf.mxu2 }
 0x10c   : > { %v452_v14 = vadd.f32 %v1095_v4, %v451_v13 }
 0x10e   : > { %v529_v15 = vadd.f32 %v528_v12, %v452_v14 }
 0x110   : > { %553 = vst.msk [vmem:[%s1101_s6 + $0x90] sm:$0xff] %vm534_vm2, %v529_v15 }
 0x113   : > { %v454_v16 = vpop.f32.mrf.mxu2 }
 0x114   : > { %v455_v18 = vadd.f32 %v1095_v4, %v454_v16 }
 0x116   : > { %v532_v19 = vadd.f32 %v531_v17, %v455_v18 }
 0x118   : > { %554 = vst.msk [vmem:[%s1101_s6 + $0x98] sm:$0xff] %vm534_vm2, %v532_v19 }
 0x119 PF: > { %s18_s19 = sadd.s32 1, %s870_s19   ;;  %s1185_s14 = smov %s854_s15 }
 0x11a   : > { %p15_p0 = scmp.ge.s32.totalorder %s18_s19, 4   ;;  %s1186_s15 = smov %s858_s16 }
 0x11b   : > { %s1187_s16 = smov %s942_s24  ;;  %s1188_s17 = smov %s866_s18 }
 0x11c   : > { %s1189_s18 = smov %s1191_s20  ;;  %17 = sbr.rel (!%p15_p0) target bundleno = 7 (0x7), region = 78 }
 0x121   :  { %582 = vsyncpa [#allocation4], 1 }
 0x122   :  { %584 = vsyncpa [#allocation4 + $0x1], 1 }

</bundles_post_ra>
